<compile_context>
chip_gen: v7x
topology: tpu7x:2x2x1
jax: 0.10.0
libtpu: 0.0.40
codegen_flags: <defaults>
</compile_context>

<pallas_src>
import jax
import jax.numpy as jnp
from jax import lax
from jax.experimental import pallas as pl
from jax.experimental.pallas import tpu as pltpu  # noqa: F401  (kept for TPU-specific tweaks)

# ----------------------------- configuration -------------------------------------------------
B = 2            # batch
S = 8            # sequence length (the dim that is mean-reduced / repeated)
INPUT_SIZE = 24  # input_size
D = 32           # output_size
Z_SIZE = 16      # z_size
DEPTH = 3        # depth  -> mlp = [Linear(24,32), Linear(32,32)]  (depth-1 layers)


# ----------------------------- fused Pallas kernel -------------------------------------------
def _danlink_kernel(x_ref, w1_ref, b1_ref, w2_ref, b2_ref, wz_ref, bz_ref, o_ref):
    # input = x.mean(-2): reduce the sequence (sublane) axis.
    h = jnp.mean(x_ref[...], axis=1)                                          # (B, INPUT_SIZE)

    # mlp (highway=False => plain Linear stack with no activation in between).
    h = jnp.dot(h, w1_ref[...], preferred_element_type=jnp.float32) + b1_ref[...]   # (B, D)
    h = jnp.dot(h, w2_ref[...], preferred_element_type=jnp.float32) + b2_ref[...]   # (B, D)

    # Fused loc|scale head: one (D, 2*Z) matmul -> (B, 2*Z) lane-dense result.
    z = jnp.dot(h, wz_ref[...], preferred_element_type=jnp.float32) + bz_ref[...]

    # softplus (threshold=20, matching torch.nn.Softplus) applied only to the 'scale'
    # half via a lane-index mask; the 'loc' half keeps its identity activation.
    sp = jnp.where(z > 20.0, z, jnp.log(1.0 + jnp.exp(jnp.minimum(z, 20.0))))
    lane = lax.broadcasted_iota(jnp.int32, z.shape, 1)
    zz = jnp.where(lane < Z_SIZE, z, sp)                                      # (B, 2*Z)

    # outputs.unsqueeze(-2).repeat(..., S, 1): broadcast over the sequence axis and store.
    o_ref[...] = jnp.broadcast_to(zz[:, None, :], o_ref.shape)                # (B, S, 2*Z)


def pallas_forward(x, P):
    # Single fused kernel, no grid: every operand is one whole-array VMEM block.
    out = pl.pallas_call(
        _danlink_kernel,
        out_shape=jax.ShapeDtypeStruct((B, S, 2 * Z_SIZE), jnp.float32),
    )(x, P["w1"], P["b1"], P["w2"], P["b2"], P["wz"], P["bz"])
    return {"loc": out[..., :Z_SIZE], "scale": out[..., Z_SIZE:]}


# ----------------------------- parameter init ------------------------------------------------
def init_params(key):
    ks = jax.random.split(key, 8)

    def rnd(k, shape, s=0.2):
        return jax.random.normal(k, shape, jnp.float32) * jnp.float32(s)

    w1 = rnd(ks[0], (INPUT_SIZE, D)); b1 = rnd(ks[1], (1, D), 0.05)
    w2 = rnd(ks[2], (D, D));          b2 = rnd(ks[3], (1, D), 0.05)
    w_loc = rnd(ks[4], (D, Z_SIZE));  b_loc = rnd(ks[5], (1, Z_SIZE), 0.05)
    w_scale = rnd(ks[6], (D, Z_SIZE)); b_scale = rnd(ks[7], (1, Z_SIZE), 0.05)

    return dict(
        w1=w1, b1=b1, w2=w2, b2=b2,
        w_loc=w_loc, b_loc=b_loc, w_scale=w_scale, b_scale=b_scale,
        # fused loc|scale head, precomputed once host-side (per perf review)
        wz=jnp.concatenate([w_loc, w_scale], axis=1),   # (D, 2*Z)
        bz=jnp.concatenate([b_loc, b_scale], axis=1),   # (1, 2*Z)
    )


# ----------------------------- pure-JAX reference (sanity check) -----------------------------
def ref_forward(x, P):
    h = x.mean(axis=-2)                                   # (B, INPUT_SIZE)
    h = h @ P["w1"] + P["b1"]
    h = h @ P["w2"] + P["b2"]
    h = jnp.broadcast_to(h[:, None, :], (x.shape[0], x.shape[1], D))
    loc = h @ P["w_loc"] + P["b_loc"]
    scale = jax.nn.softplus(h @ P["w_scale"] + P["b_scale"])
    return {"loc": loc, "scale": scale}


# ----------------------------- main -----------------------------------------------------------
if __name__ == "__main__":
    key = jax.random.PRNGKey(0)
    k_x, k_p = jax.random.split(key)
    x = jax.random.normal(k_x, (B, S, INPUT_SIZE), jnp.float32)
    params = init_params(k_p)

    out = jax.jit(pallas_forward)(x, params)
    out = jax.block_until_ready(out)

    ref = ref_forward(x, params)
    for name in ("loc", "scale"):
        assert out[name].shape == (B, S, Z_SIZE)
        assert out[name].dtype == jnp.float32
        if not bool(jnp.allclose(out[name], ref[name], atol=1e-3, rtol=1e-3)):
            raise AssertionError(f"mismatch in z_params['{name}']")

    print("KERNEL_OK")
</pallas_src>

<mosaic_0001>
module attributes {stable_mosaic.version = 11 : i64} {
  func.func @_danlink_kernel(%arg0: memref<2x8x24xf32, #tpu.memory_space<vmem>>, %arg1: memref<24x32xf32, #tpu.memory_space<vmem>>, %arg2: memref<1x32xf32, #tpu.memory_space<vmem>>, %arg3: memref<32x32xf32, #tpu.memory_space<vmem>>, %arg4: memref<1x32xf32, #tpu.memory_space<vmem>>, %arg5: memref<32x32xf32, #tpu.memory_space<vmem>>, %arg6: memref<1x32xf32, #tpu.memory_space<vmem>>, %arg7: memref<2x8x32xf32, #tpu.memory_space<vmem>>) attributes {dimension_semantics = [], scalar_prefetch = 0 : i64, scratch_operands = 0 : i64, tpu.core_type = #tpu.core_type<tc>} {
    %c0 = arith.constant 0 : index
    %c0_0 = arith.constant 0 : index
    %c0_1 = arith.constant 0 : index
    %0 = vector.load %arg0[%c0, %c0_0, %c0_1] : memref<2x8x24xf32, #tpu.memory_space<vmem>>, vector<2x8x24xf32>
    %cst = arith.constant dense<0.000000e+00> : vector<2x24xf32>
    %1 = vector.multi_reduction <add>, %0, %cst [1] : vector<2x8x24xf32> to vector<2x24xf32>
    %cst_2 = arith.constant 8.000000e+00 : f32
    %2 = vector.broadcast %cst_2 : f32 to vector<2x24xf32>
    %3 = arith.divf %1, %2 : vector<2x24xf32>
    %c0_3 = arith.constant 0 : index
    %c0_4 = arith.constant 0 : index
    %4 = vector.load %arg1[%c0_3, %c0_4] : memref<24x32xf32, #tpu.memory_space<vmem>>, vector<24x32xf32>
    %cst_5 = arith.constant dense<0.000000e+00> : vector<2x32xf32>
    %5 = tpu.matmul %3, %4, %cst_5 {dimension_numbers = #tpu.dot_dimension_numbers<[1], [0], [0], [1], [0, 0, 1, 1], [], []>} : vector<2x24xf32>, vector<24x32xf32>, vector<2x32xf32> -> vector<2x32xf32>
    %c0_6 = arith.constant 0 : index
    %c0_7 = arith.constant 0 : index
    %6 = vector.load %arg2[%c0_6, %c0_7] : memref<1x32xf32, #tpu.memory_space<vmem>>, vector<1x32xf32>
    %7 = vector.broadcast %6 : vector<1x32xf32> to vector<2x32xf32>
    %8 = arith.addf %5, %7 : vector<2x32xf32>
    %c0_8 = arith.constant 0 : index
    %c0_9 = arith.constant 0 : index
    %9 = vector.load %arg3[%c0_8, %c0_9] : memref<32x32xf32, #tpu.memory_space<vmem>>, vector<32x32xf32>
    %cst_10 = arith.constant dense<0.000000e+00> : vector<2x32xf32>
    %10 = tpu.matmul %8, %9, %cst_10 {dimension_numbers = #tpu.dot_dimension_numbers<[1], [0], [0], [1], [0, 0, 1, 1], [], []>} : vector<2x32xf32>, vector<32x32xf32>, vector<2x32xf32> -> vector<2x32xf32>
    %c0_11 = arith.constant 0 : index
    %c0_12 = arith.constant 0 : index
    %11 = vector.load %arg4[%c0_11, %c0_12] : memref<1x32xf32, #tpu.memory_space<vmem>>, vector<1x32xf32>
    %12 = vector.broadcast %11 : vector<1x32xf32> to vector<2x32xf32>
    %13 = arith.addf %10, %12 : vector<2x32xf32>
    %c0_13 = arith.constant 0 : index
    %c0_14 = arith.constant 0 : index
    %14 = vector.load %arg5[%c0_13, %c0_14] : memref<32x32xf32, #tpu.memory_space<vmem>>, vector<32x32xf32>
    %cst_15 = arith.constant dense<0.000000e+00> : vector<2x32xf32>
    %15 = tpu.matmul %13, %14, %cst_15 {dimension_numbers = #tpu.dot_dimension_numbers<[1], [0], [0], [1], [0, 0, 1, 1], [], []>} : vector<2x32xf32>, vector<32x32xf32>, vector<2x32xf32> -> vector<2x32xf32>
    %c0_16 = arith.constant 0 : index
    %c0_17 = arith.constant 0 : index
    %16 = vector.load %arg6[%c0_16, %c0_17] : memref<1x32xf32, #tpu.memory_space<vmem>>, vector<1x32xf32>
    %17 = vector.broadcast %16 : vector<1x32xf32> to vector<2x32xf32>
    %18 = arith.addf %15, %17 : vector<2x32xf32>
    %cst_18 = arith.constant 2.000000e+01 : f32
    %19 = vector.broadcast %cst_18 : f32 to vector<2x32xf32>
    %20 = arith.cmpf ogt, %18, %19 : vector<2x32xf32>
    %cst_19 = arith.constant 2.000000e+01 : f32
    %21 = vector.broadcast %cst_19 : f32 to vector<2x32xf32>
    %22 = arith.minimumf %18, %21 : vector<2x32xf32>
    %23 = math.exp %22 : vector<2x32xf32>
    %cst_20 = arith.constant 1.000000e+00 : f32
    %24 = vector.broadcast %cst_20 : f32 to vector<2x32xf32>
    %25 = arith.addf %24, %23 : vector<2x32xf32>
    %26 = math.log %25 : vector<2x32xf32>
    %27 = arith.select %20, %18, %26 : vector<2x32xi1>, vector<2x32xf32>
    %28 = tpu.iota {dimensions = array<i32: 1>} : vector<2x32xi32>
    %c16_i32 = arith.constant 16 : i32
    %29 = vector.broadcast %c16_i32 : i32 to vector<2x32xi32>
    %30 = arith.cmpi slt, %28, %29 : vector<2x32xi32>
    %31 = arith.select %30, %18, %27 : vector<2x32xi1>, vector<2x32xf32>
    %32 = vector.shape_cast %31 : vector<2x32xf32> to vector<2x1x32xf32>
    %33 = vector.shape_cast %32 : vector<2x1x32xf32> to vector<2x1x32xf32>
    %34 = vector.broadcast %33 : vector<2x1x32xf32> to vector<2x8x32xf32>
    %c0_21 = arith.constant 0 : index
    %c0_22 = arith.constant 0 : index
    %c0_23 = arith.constant 0 : index
    %35 = vector.load %arg7[%c0_21, %c0_22, %c0_23] : memref<2x8x32xf32, #tpu.memory_space<vmem>>, vector<2x8x32xf32>
    tpu.vector_store %arg7[%c0_21, %c0_22, %c0_23], %34 {strides = array<i32>} : memref<2x8x32xf32, #tpu.memory_space<vmem>>, vector<2x8x32xf32>,
    return
  }
}

</mosaic_0001>

<bundles_post_ra>
// kernel: pallas_forward.1
= control target key start
LH: loop header
LB: loop body
LE: loop exit
PB: predicated region body
PF: predicated region fallthrough
CT: control target
= control target key end

     0   :  { %12 = vsyncpa [#allocation3], 0  ;;  %s733_s0 = inlined_call_operand.hbm [shape: f32[2,8,24], index: 0, kind: input, shape index: {}]   ;;  %s734_s1 = inlined_call_operand.hbm [shape: f32[24,32], index: 1, kind: input, shape index: {}]   ;;  %s735_s2 = inlined_call_operand.vmem [shape: f32[1,32], index: 2, kind: input, shape index: {}]   ;;  %s736_s3 = inlined_call_operand.hbm [shape: f32[32,32], index: 3, kind: input, shape index: {}]   ;;  %s737_s4 = inlined_call_operand.vmem [shape: f32[1,32], index: 4, kind: input, shape index: {}]   ;;  %s738_s5 = inlined_call_operand.hbm [shape: f32[32,32], index: 5, kind: input, shape index: {}]   ;;  %s739_s6 = inlined_call_operand.vmem [shape: f32[1,32], index: 6, kind: input, shape index: {}]   ;;  %s740_s7 = inlined_call_operand.vmem [shape: f32[2,8,32], index: 7, kind: output, shape index: {}]  }
   0x1   :  { %13 = vsyncpa [#allocation5], 0 }
   0x2   :  { %14 = vsyncpa [#allocation8], 0  ;;  %s584_s24 = smov [#allocation4]   ;;  %s585_s26 = smov [#allocation2]  }
   0x3   :  { %s32_s25 = sshll.u32 %s584_s24, 4  ;;  %s20_s27 = sshll.u32 %s585_s26, 4  ;;  %s33_s25 = int_to_ptr.vmem [resolvable:$true] %s32_s25  ;;  %s634_s27 = int_to_ptr.vmem [resolvable:$true] %s20_s27 }
   0x4   :  { %s490_s30 = scalar_lea.hbm %s734_s1, 384 }
   0x5   :  { %p491_p0 = scmp.ne.s32.totalorder %s734_s1, %s490_s30  ;;  %p494_p1 = scmp.lt.u32.totalorder %s490_s30, %s734_s1 }
   0x7   :  { %p496_p2 = pnand %p494_p1, %p491_p0 }
   0x9   :  { %499 = shalt.err (!%p496_p2)
}
   0xa   :  { %s500_s12 = scalar_lea.vmem %s33_s25, 384  ;;  %p505_p4 = scmp.lt.s32.totalorder %s33_s25, %s33_s25 }
   0xb   :  { %p501_p3 = scmp.ne.s32.totalorder %s33_s25, %s500_s12  ;;  %p506_p5 = scmp.lt.s32.totalorder %s500_s12, %s500_s12 }
   0xd   :  { %p507_p6 = por %p506_p5, %p505_p4 }
   0xf   :  { %p508_p7 = pnand %p507_p6, %p501_p3 }
  0x11   :  { %511 = shalt.err (!%p508_p7)
}
  0x12   :  { %s586_s13 = smov 128   ;;  %s587_s14 = smov 8  }
  0x13   :  { %38 = dma.hbm_to_vmem [thread:$0]  %s734_s1, 384, %s33_s25, [#allocation5], %s586_s13, %s586_s13, %s587_s14  }
  0x14   :  { %s512_s19 = scalar_lea.hbm %s733_s0, 256 }
  0x15   :  { %p513_p8 = scmp.ne.s32.totalorder %s733_s0, %s512_s19  ;;  %p516_p9 = scmp.lt.u32.totalorder %s512_s19, %s733_s0 }
  0x17   :  { %p518_p10 = pnand %p516_p9, %p513_p8 }
  0x19   :  { %521 = shalt.err (!%p518_p10)
}
  0x1a   :  { %s522_s24 = scalar_lea.vmem %s634_s27, 256  ;;  %p527_p12 = scmp.lt.s32.totalorder %s634_s27, %s634_s27 }
  0x1b   :  { %p523_p11 = scmp.ne.s32.totalorder %s634_s27, %s522_s24  ;;  %p528_p13 = scmp.lt.s32.totalorder %s522_s24, %s522_s24 }
  0x1d   :  { %p529_p0 = por %p528_p13, %p527_p12 }
  0x1f   :  { %p530_p1 = pnand %p529_p0, %p523_p11 }
  0x21   :  { %533 = shalt.err (!%p530_p1)
}
  0x22   :  { %26 = dma.hbm_to_vmem [thread:$0]  %s733_s0, 256, %s634_s27, [#allocation3], %s586_s13, %s586_s13, %s587_s14  }
  0x23   :  { %s588_s26 = smov [#allocation6]   ;;  %s589_s29 = smov [#allocation7]  }
  0x24   :  { %s46_s28 = sshll.u32 %s588_s26, 4  ;;  %s60_s30 = sshll.u32 %s589_s29, 4  ;;  %s47_s28 = int_to_ptr.vmem [resolvable:$true] %s46_s28  ;;  %s671_s30 = int_to_ptr.vmem [resolvable:$true] %s60_s30 }
  0x25   :  { %s534_s10 = scalar_lea.hbm %s736_s3, 512 }
  0x26   :  { %p535_p2 = scmp.ne.s32.totalorder %s736_s3, %s534_s10  ;;  %p538_p3 = scmp.lt.u32.totalorder %s534_s10, %s736_s3 }
  0x28   :  { %p540_p4 = pnand %p538_p3, %p535_p2 }
  0x2a   :  { %543 = shalt.err (!%p540_p4)
}
  0x2b   :  { %s544_s0 = scalar_lea.vmem %s47_s28, 512  ;;  %p549_p6 = scmp.lt.s32.totalorder %s47_s28, %s47_s28 }
  0x2c   :  { %p545_p5 = scmp.ne.s32.totalorder %s47_s28, %s544_s0  ;;  %p550_p7 = scmp.lt.s32.totalorder %s544_s0, %s544_s0 }
  0x2e   :  { %p551_p8 = por %p550_p7, %p549_p6 }
  0x30   :  { %p552_p9 = pnand %p551_p8, %p545_p5 }
  0x32   :  { %555 = shalt.err (!%p552_p9)
}
  0x33   :  { %52 = dma.hbm_to_vmem [thread:$0]  %s736_s3, 512, %s47_s28, [#allocation5], %s586_s13, %s586_s13, %s587_s14  }
  0x34   :  { %s556_s20 = scalar_lea.hbm %s738_s5, 512 }
  0x35   :  { %p557_p10 = scmp.ne.s32.totalorder %s738_s5, %s556_s20  ;;  %p560_p11 = scmp.lt.u32.totalorder %s556_s20, %s738_s5 }
  0x37   :  { %p562_p12 = pnand %p560_p11, %p557_p10 }
  0x39   :  { %565 = shalt.err (!%p562_p12)
}
  0x3a   :  { %s566_s1 = scalar_lea.vmem %s671_s30, 512  ;;  %p571_p0 = scmp.lt.s32.totalorder %s671_s30, %s671_s30 }
  0x3b   :  { %p567_p13 = scmp.ne.s32.totalorder %s671_s30, %s566_s1  ;;  %p572_p1 = scmp.lt.s32.totalorder %s566_s1, %s566_s1 }
  0x3d   :  { %p573_p2 = por %p572_p1, %p571_p0 }
  0x3f   :  { %p574_p3 = pnand %p573_p2, %p567_p13 }
  0x41   :  { %577 = shalt.err (!%p574_p3)
}
  0x42   :  { %66 = dma.hbm_to_vmem [thread:$0]  %s738_s5, 512, %s671_s30, [#allocation8], %s586_s13, %s586_s13, %s587_s14  }
  0x43   :  { %578 = dma.done.wait [#allocation3], 256  }
  0x44   :  { %579 = vsyncadd [#allocation3], 4294967040 }
  0x45   :  { %580 = dma.done.wait [#allocation5], 896  }
  0x46   :  { %581 = vsyncadd [#allocation5], 4294966400 }
  0x47   :  { %582 = dma.done.wait [#allocation8], 512  }
  0x48   :  { %583 = vsyncadd [#allocation8], 4294966784  ;;  %v590_v0 = vmov 0.0|0.0   ;;  %vm591_vm0 = vmmov 0   ;;  %v592_v1 = vmov 0.0   ;;  %vm83_vm1 = vcmask 195584  }
  0x49   :  { %461 = vmatprep.subr.bf16.mxu0 %v590_v0  ;;  %436 = vmatprep.mubr.msk.f32.mxu0 %vm591_vm0, %v592_v1  ;;  %v101_v2 = vld [vmem:[#allocation4] sm:$0xff]  ;;  %v102_v3 = vld [vmem:[#allocation4 + $0x8] sm:$0xff]  ;;  %v81_v5 = vld [vmem:[#allocation2] sm:$0xff]  ;;  %vm113_vm2 = vcmask 1041409   ;;  %vm198_vm3 = vcmask 261120   ;;  %v364_v53 = vlaneseq }
  0x4a   :  { %464 = vmatprep.subr.bf16.mxu1 %v590_v0  ;;  %447 = vmatprep.mubr.msk.f32.mxu1 %vm591_vm0, %v592_v1  ;;  %v462_v4 = vpack.c.bf16 %v102_v3, %v101_v2  ;;  %v82_v6 = vld [vmem:[#allocation2 + $0x8] sm:$0xff]  ;;  %v84_v8 = vsel %vm83_vm1, %v81_v5, 0.0  ;;  %v188_v10 = vld [vmem:[#allocation6 + $0x8] sm:$0xff]  ;;  %v103_v14 = vld [vmem:[#allocation4 + $0x10] sm:$0xff]  ;;  %v593_v54 = vmov 1966171168  }
  0x4b   :  { %v187_v7 = vld [vmem:[#allocation6] sm:$0xff]  ;;  %v91_v9 = vsel %vm83_vm1, %v82_v6, 0.0  ;;  %v85_v11 = vrot.slane %v84_v8, 4  ;;  %v189_v28 = vld [vmem:[#allocation6 + $0x10] sm:$0xff]  ;;  %v190_v29 = vld [vmem:[#allocation6 + $0x18] sm:$0xff]  ;;  %v370_v55 = vunpack.c.l.s4 %v593_v54  ;;  %v365_v56 = vand.u32 127, %v364_v53 }
  0x4c   :  { %463 = vmatpush3.bf16.msra.mxu0 %v462_v4  ;;  %v92_v12 = vrot.slane %v91_v9, 4  ;;  %v465_v13 = vpack.c.bf16 %v188_v10, %v187_v7  ;;  %v468_v30 = vpack.c.bf16 %v190_v29, %v189_v28  ;;  %v272_v31 = vld [vmem:[#allocation7] sm:$0xff]  ;;  %v273_v32 = vld [vmem:[#allocation7 + $0x8] sm:$0xff]  ;;  %v274_v38 = vld [vmem:[#allocation7 + $0x10] sm:$0xff]  ;;  %v373_v58 = vshrl.u32 %v364_v53, 7 }
  0x4d   :  { %434 = vmatprep.subr.mxu0 %v592_v1  ;;  %v86_v15 = vadd.f32 %v85_v11, %v84_v8  ;;  %v471_v33 = vpack.c.bf16 %v273_v32, %v272_v31  ;;  %v410_v34 = vld [vmem:[%s735_s2] ss:$0 sm:$0xff]  ;;  %v275_v39 = vld [vmem:[#allocation7 + $0x18] sm:$0xff]  ;;  %v371_v57 = vunpack.c.0.s8 %v370_v55  ;;  %vm366_vm4 = vcmp.lt.s32.totalorder %v365_v56, 16 }
  0x4e   :  { %v93_v16 = vadd.f32 %v92_v12, %v91_v9  ;;  %466 = vmatpush3.bf16.msra.mxu1 %v465_v13  ;;  %v474_v40 = vpack.c.bf16 %v275_v39, %v274_v38  ;;  %v412_v41 = vld [vmem:[%s737_s4] ss:$0 sm:$0xff] }
  0x4f   :  { %467 = vmatprep.subr.bf16.mxu1 %v590_v0  ;;  %v87_v17 = vrot.slane %v86_v15, 2  ;;  %v414_v45 = vld [vmem:[%s739_s6] ss:$0 sm:$0xff]  ;;  %v374_v61 = vsub.s32 %v371_v57, %v373_v58 }
  0x50   :  { %435 = vmatpush3.msra.mxu0 %v103_v14  ;;  %v94_v18 = vrot.slane %v93_v16, 2 }
  0x51   :  { %470 = vmatprep.subr.bf16.mxu0 %v590_v0  ;;  %v88_v19 = vadd.f32 %v87_v17, %v86_v15 }
  0x52   :  { %v95_v20 = vadd.f32 %v94_v18, %v93_v16  ;;  %469 = vmatpush3.bf16.msra.mxu1 %v468_v30 }
  0x53   :  { %v89_v21 = vrot.slane %v88_v19, 1 }
  0x54   :  { %v96_v22 = vrot.slane %v95_v20, 1 }
  0x55   :  { %v90_v23 = vadd.f32 %v89_v21, %v88_v19 }
  0x56   :  { %v97_v24 = vadd.f32 %v96_v22, %v95_v20 }
  0x57   :  { %v99_v25 = vmul.f32 0.125, %v90_v23 }
  0x58   :  { %v100_v26 = vmul.f32 0.125, %v97_v24 }
  0x5a   :  { %v114_v27 = vsel %vm113_vm2, %v100_v26, %v99_v25 }
  0x5b   :  { %437 = vmatmul.mubr.msk.f32.vlgmr.msra.gmra.mrb[0].mxu0 %vm83_vm1, %v114_v27 }
  0x5c   :  { %458 = vmatprep.mubr.msk.f32.mxu0 %vm591_vm0, %v592_v1  ;;  %472 = vmatpush3.bf16.msra.mxu0 %v471_v33  ;;  %v393_v1 = vsub.s32 0, %v373_v58 }
  0x5d   :  { %473 = vmatprep.subr.bf16.mxu0 %v590_v0 }
  0x60   :  { %475 = vmatpush3.bf16.msra.mxu0 %v474_v40 }
 0x12e   :  { %v183_v35 = vpop.f32.mrb[0].mxu0 }
 0x12f   :  { %v184_v36 = vadd.f32 %v410_v34, %v183_v35  ;;  %v438_v37 = vpop.f32.mrb[1].mxu0 }
 0x131   :  { %448 = vmatmul.mubr.msk.f32.vlgmr.msra.gmra.mrb[0].mxu1 %vm198_vm3, %v184_v36 }
 0x204   :  { %v268_v42 = vpop.f32.mrb[0].mxu1 }
 0x205   :  { %v269_v43 = vadd.f32 %v412_v41, %v268_v42  ;;  %v449_v44 = vpop.f32.mrb[1].mxu1 }
 0x207   :  { %459 = vmatmul.mubr.msk.f32.vlgmr.msra.gmra.mrb[2].mxu0 %vm198_vm3, %v269_v43 }
 0x2da   :  { %v352_v46 = vpop.f32.mrb[2].mxu0 }
 0x2db   :  { %v353_v47 = vadd.f32 %v414_v45, %v352_v46  ;;  %v460_v48 = vpop.f32.mrb[3].mxu0 }
 0x2dd   :  { %v357_v49 = vmin.f32 %v353_v47, 20.0  ;;  %vm356_vm5 = vcmp.gt.f32.partialorder %v353_v47, 20.0 }
 0x2df   :  { %v358_v50 = vmul.f32 1.442695, %v357_v49 }
 0x2e1   :  { %486 = vpow2.f32 %v358_v50 }
 0x2eb   :  { %v487_v51 = vpop.eup %486 }
 0x2ec   :  { %v360_v52 = vadd.f32 1.0, %v487_v51 }
 0x2ee   :  { %488 = vlog2.f32 %v360_v52 }
 0x2f8   :  { %v489_v59 = vpop.eup %488 }
 0x2f9   :  { %v362_v60 = vmul.f32 0.6931472, %v489_v59 }
 0x2fb   :  { %v363_v62 = vsel %vm356_vm5, %v353_v47, %v362_v60 }
 0x2fc   :  { %v367_v63 = vsel %vm366_vm4, %v353_v47, %v363_v62 }
 0x2fd   :  { %v375_v0 = vrot.slane %v367_v63, %v374_v61 }
 0x2ff   :  { %v376_v2 = vcombine.high %v375_v0, %v375_v0  ;;  %v383_v3 = vrot.slane %v375_v0, %v374_v61 }
 0x301   :  { %v390_v4 = vrot.slane %v376_v2, %v374_v61  ;;  %v394_v5 = vrot.slane %v383_v3, %v393_v1 }
 0x303   :  { %v398_v6 = vrot.slane %v390_v4, %v393_v1  ;;  %401 = vst.msk [vmem:[%s740_s7] sm:$0xff] %vm198_vm3, %v394_v5 }
 0x305   :  { %402 = vst.msk [vmem:[%s740_s7 + $0x8] sm:$0xff] %vm198_vm3, %v398_v6 }
 0x306   :  { %407 = vsyncpa [#allocation3], 1 }
 0x307   :  { %408 = vsyncpa [#allocation5], 1 }
 0x308   :  { %409 = vsyncpa [#allocation8], 1 }

</bundles_post_ra>
